<compile_context>
chip_gen: v5e
topology: v5e:2x2
jax: 0.10.0
libtpu: 0.0.40
codegen_flags: <defaults>
</compile_context>

<pallas_src>
import math

import jax
import jax.numpy as jnp
import numpy as np
from jax import lax
from jax.experimental import pallas as pl
from jax.experimental.pallas import tpu as pltpu

BN_EPS = 1e-5
_LANE = 128                          # Cout is zero-padded to lane width
_INV_SQRT2 = 1.0 / math.sqrt(2.0)
_SQRT_2_OVER_PI = math.sqrt(2.0 / math.pi)
_VMEM_LIMIT = 32 * 1024 * 1024       # scoped limit, safe on v5e/v6e/v7x
_VMEM_BUDGET = 24 * 1024 * 1024      # tile-sizing budget (headroom under limit)
_MAX_TILE_M = 4096                   # diminishing returns past ~2-4K rows


def _round_up(x, m):
    return (x + m - 1) // m * m


def _ceil_div(a, b):
    return -(-a // b)


# ---------------------------------------------------------------------------
# Pass 1: conv matmul per M-tile + per-channel sum / sum-of-squares
# (training-mode BatchNorm statistics).  Grid = (shard "parallel",
# m-tile "arbitrary"); per-shard partials live in a VMEM scratch and are
# written to the (1,8,128) output block once, on the last inner step.
# ---------------------------------------------------------------------------
def _conv_stats_kernel(p_ref, w_ref, stats_ref, acc_ref):
    i = pl.program_id(1)

    @pl.when(i == 0)
    def _init():
        acc_ref[...] = jnp.zeros_like(acc_ref)

    # MXU matmul; f32 accumulation regardless of operand dtype.
    y = jnp.dot(p_ref[...], w_ref[...], preferred_element_type=jnp.float32)
    upd = jnp.concatenate(
        [jnp.sum(y, axis=0, keepdims=True),
         jnp.sum(y * y, axis=0, keepdims=True)], axis=0)
    acc_ref[0:2, :] += upd              # single (2,128) RMW per grid step

    @pl.when(i == pl.num_programs(1) - 1)
    def _finalize():
        stats_ref[0] = acc_ref[...]


# ---------------------------------------------------------------------------
# Pass 2: conv matmul per M-tile + folded BatchNorm (one FMA per element)
# + GELU.  Lane-dense (tile_m, 128) output store.
# ---------------------------------------------------------------------------
def _make_conv_bn_act_kernel(approx_gelu):
    def kernel(p_ref, w_ref, scale_ref, shift_ref, o_ref):
        y = jnp.dot(p_ref[...], w_ref[...], preferred_element_type=jnp.float32)
        z = y * scale_ref[...] + shift_ref[...]
        if approx_gelu:
            # tanh-approx GELU: tanh routes to the EUP slot (separate from VPU).
            g = 0.5 * z * (1.0 + jnp.tanh(
                jnp.float32(_SQRT_2_OVER_PI)
                * (z + jnp.float32(0.044715) * z * z * z)))
        else:
            # exact GELU (nn.GELU default).  NOTE: lax.erf lowers to a VPU
            # polynomial, NOT the EUP; use approx_gelu=True if pass 2 is
            # VALU-bound and the consumer tolerates tanh-GELU numerics.
            g = 0.5 * z * (1.0 + lax.erf(z * jnp.float32(_INV_SQRT2)))
        o_ref[...] = g.astype(o_ref.dtype)
    return kernel


def conv_stem_forward(x_nchw, w_oihw, gamma, beta, stride, *,
                      tile_m=2048,
                      matmul_dtype=jnp.bfloat16,
                      out_dtype=jnp.float32,
                      out_layout="NCHW",
                      approx_gelu=False):
    """x_nchw: (N, Cin, H, W) f32; w_oihw: (Cout, Cin, 3, 3) f32."""
    N, Cin, H, W = x_nchw.shape
    Cout = w_oihw.shape[0]
    Ho = (H - 3 + 2 * 1) // stride + 1
    Wo = (W - 3 + 2 * 1) // stride + 1
    M = N * Ho * Wo
    K = Cin * 9

    in_isz = jnp.dtype(matmul_dtype).itemsize
    out_isz = jnp.dtype(out_dtype).itemsize

    # --- host-side im2col, built directly in the matmul dtype (no extra cast
    #     pass over the M*K patch matrix). ---
    xp = jnp.pad(x_nchw, ((0, 0), (0, 0), (1, 1), (1, 1))).astype(matmul_dtype)
    slabs = []
    for ki in range(3):
        for kj in range(3):
            slabs.append(
                xp[:, :,
                   ki:ki + stride * (Ho - 1) + 1:stride,
                   kj:kj + stride * (Wo - 1) + 1:stride])
    # (3,3,N,Cin,Ho,Wo) -> (N,Ho,Wo,Cin,3,3) -> (M, Cin*9)  [matches
    # weight.reshape(Cout, Cin*9) column order: cin-major, then kh, kw]
    patches = jnp.stack(slabs, axis=0).reshape(3, 3, N, Cin, Ho, Wo)
    patches = patches.transpose(2, 4, 5, 3, 0, 1).reshape(M, K)

    # --- M tiling: VMEM-budget-aware tile size, multiple of 16 (bf16 sublane
    #     packing), capped for diminishing returns and v7x's smaller VMEM. ---
    per_row = 2 * K * in_isz + 2 * _LANE * out_isz           # double-buffered
    fixed = 2 * K * _LANE * in_isz + 6 * 8 * _LANE * 4       # weights + scalars
    vmem_cap = max(16, (_VMEM_BUDGET - fixed) // per_row)
    tile_m = int(min(int(tile_m), vmem_cap, _MAX_TILE_M, _round_up(M, 16)))
    tile_m = max(16, _round_up(tile_m, 16))

    n_tiles = _ceil_div(M, tile_m)
    # Pass-1 stats split into 2 per-shard partials when there is enough work:
    # both TensorCores stream half the patch matrix on v7x; a harmless extra
    # (8,128) partial on single-core v5e/v6e.
    n_shards = 2 if n_tiles >= 2 else 1
    n_inner = _ceil_div(n_tiles, n_shards)
    M_pad = tile_m * n_shards * n_inner
    if M_pad != M:
        # Zero rows contribute 0 to both channel sums / sum-of-squares, so the
        # BatchNorm statistics stay exact under the M padding.
        patches = jnp.pad(patches, ((0, M_pad - M), (0, 0)))

    # --- lane-dense params: zero-pad Cout -> 128 (padded channels have
    #     gamma=beta=0 so they stay exactly zero through BN/GELU). ---
    wmat = jnp.zeros((K, _LANE), jnp.float32).at[:, :Cout].set(
        w_oihw.reshape(Cout, K).T.astype(jnp.float32)).astype(matmul_dtype)
    gamma_p = jnp.zeros((_LANE,), jnp.float32).at[:Cout].set(
        gamma.astype(jnp.float32))
    beta_p = jnp.zeros((_LANE,), jnp.float32).at[:Cout].set(
        beta.astype(jnp.float32))

    # --------------------- pass 1: batch statistics -------------------------
    stats = pl.pallas_call(
        _conv_stats_kernel,
        out_shape=jax.ShapeDtypeStruct((n_shards, 8, _LANE), jnp.float32),
        grid=(n_shards, n_inner),
        in_specs=[
            pl.BlockSpec((tile_m, K), lambda s, i: (s * n_inner + i, 0)),
            pl.BlockSpec((K, _LANE), lambda s, i: (0, 0)),
        ],
        out_specs=pl.BlockSpec((1, 8, _LANE), lambda s, i: (s, 0, 0)),
        scratch_shapes=[pltpu.VMEM((8, _LANE), jnp.float32)],
        compiler_params=pltpu.CompilerParams(
            dimension_semantics=("parallel", "arbitrary"),
            vmem_limit_bytes=_VMEM_LIMIT),
        cost_estimate=pl.CostEstimate(
            flops=2 * M_pad * K * _LANE,
            transcendentals=0,
            bytes_accessed=(M_pad * K * in_isz + K * _LANE * in_isz
                            + n_shards * 8 * _LANE * 4)),
    )(patches, wmat)
    stats = jnp.sum(stats, axis=0)                # combine per-shard partials

    # --- fold BN into one scale/shift per channel (tiny (1,128) math) ---
    mean = stats[0, :] / jnp.float32(M)
    ex2 = stats[1, :] / jnp.float32(M)
    # TODO(synk): E[x^2]-E[x]^2 can cancel for very large M / non-zero-mean
    # activations; switch to a shifted or true two-pass variance if this stem
    # is used far beyond this config.
    var = jnp.maximum(ex2 - mean * mean, 0.0)
    inv_std = lax.rsqrt(var + jnp.float32(BN_EPS))
    scale = (gamma_p * inv_std).reshape(1, _LANE)
    shift = (beta_p - mean * gamma_p * inv_std).reshape(1, _LANE)

    # --------------------- pass 2: normalize + GELU -------------------------
    n_tiles_total = M_pad // tile_m
    out_flat = pl.pallas_call(
        _make_conv_bn_act_kernel(approx_gelu),
        out_shape=jax.ShapeDtypeStruct((M_pad, _LANE), out_dtype),
        grid=(n_tiles_total,),
        in_specs=[
            pl.BlockSpec((tile_m, K), lambda i: (i, 0)),
            pl.BlockSpec((K, _LANE), lambda i: (0, 0)),
            pl.BlockSpec((1, _LANE), lambda i: (0, 0)),
            pl.BlockSpec((1, _LANE), lambda i: (0, 0)),
        ],
        out_specs=pl.BlockSpec((tile_m, _LANE), lambda i: (i, 0)),
        compiler_params=pltpu.CompilerParams(
            dimension_semantics=("parallel",),
            vmem_limit_bytes=_VMEM_LIMIT),
        cost_estimate=pl.CostEstimate(
            flops=2 * M_pad * K * _LANE + 4 * M_pad * _LANE,
            transcendentals=M_pad * _LANE,
            bytes_accessed=(M_pad * K * in_isz + K * _LANE * in_isz
                            + 2 * _LANE * 4 + M_pad * _LANE * out_isz)),
    )(patches, wmat, scale, shift)

    # TODO(synk): consumers that accept the 128-lane-padded NHWC slab can skip
    # this slice (and the NCHW transpose) to avoid extra HBM passes.
    out = out_flat[:M, :Cout].reshape(N, Ho, Wo, Cout)
    if out_layout == "NCHW":
        out = out.transpose(0, 3, 1, 2)
    return out


def _reference(x, w, gamma, beta, stride, approx_gelu=False):
    """Pure-JAX reference (conv -> train-mode BN -> GELU)."""
    y = lax.conv_general_dilated(
        x, w, window_strides=(stride, stride), padding=((1, 1), (1, 1)),
        dimension_numbers=("NCHW", "OIHW", "NCHW"))
    mean = jnp.mean(y, axis=(0, 2, 3), keepdims=True)
    var = jnp.mean((y - mean) ** 2, axis=(0, 2, 3), keepdims=True)
    z = ((y - mean) / jnp.sqrt(var + BN_EPS)) * gamma.reshape(1, -1, 1, 1) \
        + beta.reshape(1, -1, 1, 1)
    if approx_gelu:
        return 0.5 * z * (1.0 + jnp.tanh(
            _SQRT_2_OVER_PI * (z + 0.044715 * z ** 3)))
    return 0.5 * z * (1.0 + lax.erf(z * _INV_SQRT2))


if __name__ == "__main__":
    # Module config: ConvStem(image_size=(16,16), in_channels=4,
    #                         out_channels=32, stride=2)
    N, Cin, H, W = 2, 4, 16, 16
    Cout, stride = 32, 2

    key = jax.random.PRNGKey(0)
    kx, kw = jax.random.split(key)
    x = jax.random.normal(kx, (N, Cin, H, W), dtype=jnp.float32)
    fan_in = Cin * 3 * 3
    w = jax.random.normal(kw, (Cout, Cin, 3, 3), dtype=jnp.float32) / math.sqrt(fan_in)
    gamma = 1.0 + 0.01 * jnp.arange(Cout, dtype=jnp.float32)
    beta = 0.02 * jnp.arange(Cout, dtype=jnp.float32) - 0.1

    ref = jax.block_until_ready(_reference(x, w, gamma, beta, stride))

    # 1) Default perf config: bf16 MXU operands, large VMEM-capped tile_m.
    out = jax.block_until_ready(conv_stem_forward(x, w, gamma, beta, stride))
    assert out.shape == (N, Cout, H // stride, W // stride), out.shape
    np.testing.assert_allclose(np.asarray(out), np.asarray(ref),
                               atol=5e-2, rtol=5e-2)

    # 2) f32 MXU operands: tight check against the exact reference.
    out_f32 = jax.block_until_ready(
        conv_stem_forward(x, w, gamma, beta, stride, matmul_dtype=jnp.float32))
    np.testing.assert_allclose(np.asarray(out_f32), np.asarray(ref),
                               atol=1e-4, rtol=1e-4)

    # 3) Correctness-only multi-tile run (small tile, NOT a perf config):
    #    exercises the per-shard resident stats accumulator and the zero-padded
    #    tail tile (M=128 -> 3 tiles of 48 -> 2 shards x 2 inner steps).
    out_mt = jax.block_until_ready(
        conv_stem_forward(x, w, gamma, beta, stride, tile_m=48,
                          matmul_dtype=jnp.float32))
    np.testing.assert_allclose(np.asarray(out_mt), np.asarray(ref),
                               atol=1e-4, rtol=1e-4)

    # 4) Low-HBM output path: bf16 output, NHWC layout, tanh-approx GELU.
    ref_nhwc = np.asarray(
        _reference(x, w, gamma, beta, stride, approx_gelu=True)
    ).transpose(0, 2, 3, 1)
    out_lt = jax.block_until_ready(
        conv_stem_forward(x, w, gamma, beta, stride,
                          out_dtype=jnp.bfloat16, out_layout="NHWC",
                          approx_gelu=True))
    assert out_lt.shape == (N, H // stride, W // stride, Cout), out_lt.shape
    np.testing.assert_allclose(np.asarray(out_lt).astype(np.float32), ref_nhwc,
                               atol=5e-2, rtol=5e-2)

    print("KERNEL_OK")
</pallas_src>

<mosaic_0001>
module attributes {stable_mosaic.version = 11 : i64} {
  func.func @_conv_stats_kernel(%arg0: i32, %arg1: i32, %arg2: memref<128x36xbf16, #tpu.memory_space<vmem>>, %arg3: memref<36x128xbf16, #tpu.memory_space<vmem>>, %arg4: memref<1x8x128xf32, #tpu.memory_space<vmem>>, %arg5: memref<8x128xf32, #tpu.memory_space<vmem>>) attributes {dimension_semantics = [#tpu.dimension_semantics<parallel>, #tpu.dimension_semantics<arbitrary>], iteration_bounds = array<i64: 1, 1>, scalar_prefetch = 0 : i64, scratch_operands = 1 : i64, tpu.core_type = #tpu.core_type<tc>, window_params = [{transform_indices = @transform_0, window_bounds = array<i64: 128, 36>}, {pipeline_mode = #tpu.pipeline_mode<synchronous>, transform_indices = @transform_1, window_bounds = array<i64: 36, 128>}, {transform_indices = @transform_2, window_bounds = array<i64: 1, 8, 128>}]} {
    %c0_i32 = arith.constant 0 : i32
    %0 = arith.cmpi eq, %arg1, %c0_i32 : i32
    %1 = arith.extui %0 : i1 to i32
    %c0_i32_0 = arith.constant 0 : i32
    %2 = arith.cmpi ne, %1, %c0_i32_0 : i32
    scf.if %2 {
      %cst_12 = arith.constant 0.000000e+00 : f32
      %18 = vector.broadcast %cst_12 : f32 to vector<8x128xf32>
      %c0_13 = arith.constant 0 : index
      %c0_14 = arith.constant 0 : index
      %19 = vector.load %arg5[%c0_13, %c0_14] : memref<8x128xf32, #tpu.memory_space<vmem>>, vector<8x128xf32>
      tpu.vector_store %arg5[%c0_13, %c0_14], %18 {strides = array<i32>} : memref<8x128xf32, #tpu.memory_space<vmem>>, vector<8x128xf32>,
    } else {
    }
    %c0 = arith.constant 0 : index
    %c0_1 = arith.constant 0 : index
    %3 = vector.load %arg2[%c0, %c0_1] : memref<128x36xbf16, #tpu.memory_space<vmem>>, vector<128x36xbf16>
    %c0_2 = arith.constant 0 : index
    %c0_3 = arith.constant 0 : index
    %4 = vector.load %arg3[%c0_2, %c0_3] : memref<36x128xbf16, #tpu.memory_space<vmem>>, vector<36x128xbf16>
    %cst = arith.constant dense<0.000000e+00> : vector<128x128xf32>
    %5 = tpu.matmul %3, %4, %cst {dimension_numbers = #tpu.dot_dimension_numbers<[1], [0], [0], [1], [0, 0, 1, 1], [], []>} : vector<128x36xbf16>, vector<36x128xbf16>, vector<128x128xf32> -> vector<128x128xf32>
    %cst_4 = arith.constant dense<0.000000e+00> : vector<128xf32>
    %6 = vector.multi_reduction <add>, %5, %cst_4 [0] : vector<128x128xf32> to vector<128xf32>
    %7 = vector.shape_cast %6 : vector<128xf32> to vector<1x128xf32>
    %8 = arith.mulf %5, %5 : vector<128x128xf32>
    %cst_5 = arith.constant dense<0.000000e+00> : vector<128xf32>
    %9 = vector.multi_reduction <add>, %8, %cst_5 [0] : vector<128x128xf32> to vector<128xf32>
    %10 = vector.shape_cast %9 : vector<128xf32> to vector<1x128xf32>
    %11 = tpu.concatenate %7, %10 in 0 : vector<1x128xf32>, vector<1x128xf32> -> vector<2x128xf32>
    %c0_6 = arith.constant 0 : index
    %c0_7 = arith.constant 0 : index
    %12 = vector.load %arg5[%c0_6, %c0_7] : memref<8x128xf32, #tpu.memory_space<vmem>>, vector<2x128xf32>
    %13 = arith.addf %12, %11 : vector<2x128xf32>
    %c0_8 = arith.constant 0 : index
    %c0_9 = arith.constant 0 : index
    %14 = vector.load %arg5[%c0_8, %c0_9] : memref<8x128xf32, #tpu.memory_space<vmem>>, vector<2x128xf32>
    tpu.vector_store %arg5[%c0_8, %c0_9], %13 {strides = array<i32>} : memref<8x128xf32, #tpu.memory_space<vmem>>, vector<2x128xf32>,
    %c0_i32_10 = arith.constant 0 : i32
    %15 = arith.cmpi eq, %arg1, %c0_i32_10 : i32
    %16 = arith.extui %15 : i1 to i32
    %c0_i32_11 = arith.constant 0 : i32
    %17 = arith.cmpi ne, %16, %c0_i32_11 : i32
    scf.if %17 {
      %c0_12 = arith.constant 0 : index
      %c0_13 = arith.constant 0 : index
      %18 = vector.load %arg5[%c0_12, %c0_13] : memref<8x128xf32, #tpu.memory_space<vmem>>, vector<8x128xf32>
      %c0_14 = arith.constant 0 : index
      %c0_15 = arith.constant 0 : index
      %c0_16 = arith.constant 0 : index
      %19 = vector.load %arg4[%c0_14, %c0_15, %c0_16] : memref<1x8x128xf32, #tpu.memory_space<vmem>>, vector<1x8x128xf32>
      %20 = vector.shape_cast %19 : vector<1x8x128xf32> to vector<8x128xf32>
      %21 = vector.shape_cast %18 : vector<8x128xf32> to vector<1x8x128xf32>
      tpu.vector_store %arg4[%c0_14, %c0_15, %c0_16], %21 {strides = array<i32>} : memref<1x8x128xf32, #tpu.memory_space<vmem>>, vector<1x8x128xf32>,
    } else {
    }
    return
  }
  func.func @transform_0(%arg0: i32, %arg1: i32) -> (i32, i32) {
    %c1_i32 = arith.constant 1 : i32
    %0 = arith.muli %arg0, %c1_i32 : i32
    %1 = arith.addi %0, %arg1 : i32
    %c0_i32 = arith.constant 0 : i32
    %c0_i32_0 = arith.constant 0 : i32
    return %1, %c0_i32 : i32, i32
  }
  func.func @transform_1(%arg0: i32, %arg1: i32) -> (i32, i32) {
    %c0_i32 = arith.constant 0 : i32
    %c0_i32_0 = arith.constant 0 : i32
    %c0_i32_1 = arith.constant 0 : i32
    return %c0_i32, %c0_i32_0 : i32, i32
  }
  func.func @transform_2(%arg0: i32, %arg1: i32) -> (i32, i32, i32) {
    %c0_i32 = arith.constant 0 : i32
    %c0_i32_0 = arith.constant 0 : i32
    %c0_i32_1 = arith.constant 0 : i32
    return %arg0, %c0_i32, %c0_i32_0 : i32, i32, i32
  }
}

</mosaic_0001>

<bundles_post_ra>
// kernel: tpu_custom_call.1
= control target key start
LH: loop header
LB: loop body
LE: loop exit
PB: predicated region body
PF: predicated region fallthrough
CT: control target
= control target key end

     0   :  { %vm141_vm0 = vcmask 1041408   ;;  %s440_s0 = inlined_call_operand.vmem [shape: bf16[128,36], index: 0, kind: input, shape index: {}]   ;;  %s441_s1 = inlined_call_operand.vmem [shape: bf16[36,128], index: 1, kind: input, shape index: {}]   ;;  %s442_s2 = inlined_call_operand.hbm [shape: f32[1,8,128], index: 2, kind: output, shape index: {}]  }
   0x1   :  { %v60_v0 = vld [vmem:[%s441_s1 + $0x10] sm:$0x3] }
   0x2   :  { %v110_v1 = vunpack.c.l.b16 %v60_v0 }
   0x4   :  { %v113_v2 = vpack.c.b16 %v110_v1, %v110_v1 }
   0x5   :  { %7 = vsyncpa [#allocation4], 0  ;;  %v341_v4 = vld [vmem:[%s441_s1 + $0x8] sm:$0xff]  ;;  %v340_v5 = vld [vmem:[%s441_s1] sm:$0xff]  ;;  %vm116_vm1 = vcmask 293888   ;;  %v379_v22 = vmov 0.0  }
   0x6   :  { %v143_v3 = vsel %vm141_vm0, %v113_v2, 0  ;;  %v332_v6 = vld [vmem:[%s440_s0] sm:$0xff]  ;;  %v334_v7 = vld [vmem:[%s440_s0 + $0x10] sm:$0xff]  ;;  %v333_v10 = vld [vmem:[%s440_s0 + $0x8] sm:$0xff]  ;;  %39 = vst [vmem:[#allocation2] sm:$0xff] %v379_v22  ;;  %vm252_vm2 = vcmask 1040384  }
   0x7   :  { %150 = vmatpush.bf16.msra.mxu0 %v143_v3  ;;  %342 = vmatpush.bf16.msra.mxu1 %v143_v3  ;;  %v336_v8 = vld [vmem:[%s440_s0 + $0x20] sm:$0xff]  ;;  %v338_v9 = vld [vmem:[%s440_s0 + $0x30] sm:$0xff]  ;;  %v335_v11 = vld [vmem:[%s440_s0 + $0x18] sm:$0xff]  ;;  %s269_s5 = sshll.u32 %s442_s2, 4  ;;  %s270_s5 = int_to_ptr.hbm [resolvable:$true] %s269_s5 }
   0x8   :  { %343 = vmatpush.bf16.msra.mxu2 %v143_v3  ;;  %344 = vmatpush.bf16.msra.mxu3 %v143_v3  ;;  %v337_v12 = vld [vmem:[%s440_s0 + $0x28] sm:$0xff]  ;;  %v339_v13 = vld [vmem:[%s440_s0 + $0x38] sm:$0xff]  ;;  %s380_s0 = smov [#allocation3]  }
   0x9   :  { %s267_s30 = sshll.u32 %s380_s0, 4  ;;  %s268_s30 = int_to_ptr.vmem [resolvable:$true] %s267_s30 }
   0xb   :  { %151 = vmatpush.bf16.msra.mxu0 %v341_v4  ;;  %345 = vmatpush.bf16.msra.mxu1 %v341_v4 }
   0xc   :  { %346 = vmatpush.bf16.msra.mxu2 %v341_v4  ;;  %347 = vmatpush.bf16.msra.mxu3 %v341_v4 }
   0xf   :  { %152 = vmatpush.bf16.msra.mxu0 %v340_v5  ;;  %348 = vmatpush.bf16.msra.mxu1 %v340_v5 }
  0x10   :  { %349 = vmatpush.bf16.msra.mxu2 %v340_v5  ;;  %350 = vmatpush.bf16.msra.mxu3 %v340_v5 }
  0x12   :  { %324 = vmatmul.msk.bf16.vlgmr.msra.gmra.mxu0 %vm116_vm1, %v332_v6  ;;  %326 = vmatmul.msk.bf16.vlgmr.msra.gmra.mxu1 %vm116_vm1, %v334_v7 }
  0x13   :  { %328 = vmatmul.msk.bf16.vlgmr.msra.gmra.mxu2 %vm116_vm1, %v336_v8  ;;  %330 = vmatmul.msk.bf16.vlgmr.msra.gmra.mxu3 %vm116_vm1, %v338_v9 }
  0x22   :  { %325 = vmatmul.msk.bf16.gmra.mxu0 %vm116_vm1, %v333_v10  ;;  %327 = vmatmul.msk.bf16.gmra.mxu1 %vm116_vm1, %v335_v11 }
  0x23   :  { %329 = vmatmul.msk.bf16.gmra.mxu2 %vm116_vm1, %v337_v12  ;;  %331 = vmatmul.msk.bf16.gmra.mxu3 %vm116_vm1, %v339_v13 }
  0x8f   :  { %v154_v14 = vpop.f32.mrf.mxu0  ;;  %v164_v15 = vpop.f32.mrf.mxu1 }
  0x90   :  { %v215_v25 = vmul.f32 %v154_v14, %v154_v14  ;;  %v219_v35 = vmul.f32 %v164_v15, %v164_v15 }
  0x96   :  { %v174_v17 = vpop.f32.mrf.mxu2  ;;  %v184_v20 = vpop.f32.mrf.mxu3 }
  0x97   :  { %v156_v16 = vpop.f32.mrf.mxu0  ;;  %v166_v18 = vpop.f32.mrf.mxu1  ;;  %v223_v49 = vmul.f32 %v174_v17, %v174_v17  ;;  %v227_v63 = vmul.f32 %v184_v20, %v184_v20 }
  0x98   :  { %v216_v23 = vmul.f32 %v156_v16, %v156_v16  ;;  %v194_v26 = vadd.f32 %v156_v16, %v154_v14  ;;  %v220_v39 = vmul.f32 %v166_v18, %v166_v18 }
  0x9a   :  { %v231_v28 = vadd.f32 %v216_v23, %v215_v25  ;;  %v254_v25 = vld [vmem:[#allocation2] sm:$0x3] }
  0x9e   :  { %v176_v21 = vpop.f32.mrf.mxu2  ;;  %v186_v34 = vpop.f32.mrf.mxu3 }
  0x9f   :  { %v159_v19 = vpop.f32.mrf.mxu0  ;;  %v169_v24 = vpop.f32.mrf.mxu1  ;;  %v224_v53 = vmul.f32 %v176_v21, %v176_v21  ;;  %v228_v2 = vmul.f32 %v186_v34, %v186_v34 }
  0xa0   :  { %v217_v27 = vmul.f32 %v159_v19, %v159_v19  ;;  %v195_v29 = vadd.f32 %v194_v26, %v159_v19  ;;  %v221_v43 = vmul.f32 %v169_v24, %v169_v24 }
  0xa2   :  { %v232_v31 = vadd.f32 %v231_v28, %v217_v27 }
  0xa6   :  { %v179_v38 = vpop.f32.mrf.mxu2  ;;  %v189_v52 = vpop.f32.mrf.mxu3 }
  0xa7   :  { %v161_v30 = vpop.f32.mrf.mxu0  ;;  %v171_v42 = vpop.f32.mrf.mxu1  ;;  %v225_v58 = vmul.f32 %v179_v38, %v179_v38  ;;  %v229_v7 = vmul.f32 %v189_v52, %v189_v52 }
  0xa8   :  { %v196_v32 = vadd.f32 %v195_v29, %v161_v30  ;;  %v218_v33 = vmul.f32 %v161_v30, %v161_v30  ;;  %v222_v47 = vmul.f32 %v171_v42, %v171_v42 }
  0xaa   :  { %v197_v36 = vadd.f32 %v196_v32, %v164_v15  ;;  %v233_v37 = vadd.f32 %v232_v31, %v218_v33 }
  0xac   :  { %v234_v40 = vadd.f32 %v233_v37, %v219_v35  ;;  %v198_v41 = vadd.f32 %v197_v36, %v166_v18 }
  0xae   :  { %v199_v44 = vadd.f32 %v198_v41, %v169_v24  ;;  %v235_v45 = vadd.f32 %v234_v40, %v220_v39  ;;  %v181_v56 = vpop.f32.mrf.mxu2  ;;  %v191_v5 = vpop.f32.mrf.mxu3 }
  0xaf   :  { %v226_v62 = vmul.f32 %v181_v56, %v181_v56  ;;  %v230_v11 = vmul.f32 %v191_v5, %v191_v5 }
  0xb0   :  { %v200_v46 = vadd.f32 %v199_v44, %v171_v42  ;;  %v236_v48 = vadd.f32 %v235_v45, %v221_v43 }
  0xb2   :  { %v201_v50 = vadd.f32 %v200_v46, %v174_v17  ;;  %v237_v51 = vadd.f32 %v236_v48, %v222_v47 }
  0xb4   :  { %v238_v54 = vadd.f32 %v237_v51, %v223_v49  ;;  %v202_v55 = vadd.f32 %v201_v50, %v176_v21 }
  0xb6   :  { %v203_v57 = vadd.f32 %v202_v55, %v179_v38  ;;  %v239_v59 = vadd.f32 %v238_v54, %v224_v53 }
  0xb8   :  { %v240_v60 = vadd.f32 %v239_v59, %v225_v58  ;;  %v204_v61 = vadd.f32 %v203_v57, %v181_v56 }
  0xba   :  { %v205_v0 = vadd.f32 %v204_v61, %v184_v20  ;;  %v241_v1 = vadd.f32 %v240_v60, %v226_v62 }
  0xbc   :  { %v242_v3 = vadd.f32 %v241_v1, %v227_v63  ;;  %v206_v4 = vadd.f32 %v205_v0, %v186_v34 }
  0xbe   :  { %v207_v6 = vadd.f32 %v206_v4, %v189_v52  ;;  %v243_v8 = vadd.f32 %v242_v3, %v228_v2 }
  0xc0   :  { %v244_v9 = vadd.f32 %v243_v8, %v229_v7  ;;  %v208_v10 = vadd.f32 %v207_v6, %v191_v5 }
  0xc2   :  { %v209_v12 = vrot.slane %v208_v10, 4  ;;  %v245_v13 = vadd.f32 %v244_v9, %v230_v11 }
  0xc4   :  { %v210_v14 = vadd.f32 %v209_v12, %v208_v10  ;;  %v246_v15 = vrot.slane %v245_v13, 4 }
  0xc6   :  { %v211_v16 = vrot.slane %v210_v14, 2  ;;  %v247_v17 = vadd.f32 %v246_v15, %v245_v13 }
  0xc8   :  { %v212_v18 = vadd.f32 %v211_v16, %v210_v14  ;;  %v248_v19 = vrot.slane %v247_v17, 2 }
  0xca   :  { %v213_v20 = vrot.slane %v212_v18, 1  ;;  %v249_v21 = vadd.f32 %v248_v19, %v247_v17 }
  0xcc   :  { %v250_v22 = vrot.slane %v249_v21, 1  ;;  %v214_v23 = vadd.f32 %v213_v20, %v212_v18 }
  0xce   :  { %v251_v24 = vadd.f32 %v250_v22, %v249_v21 }
  0xd0   :  { %v253_v26 = vsel %vm252_vm2, %v214_v23, %v251_v24 }
  0xd1   :  { %v255_v27 = vadd.f32 %v254_v25, %v253_v26 }
  0xd3   :  { %256 = vst [vmem:[#allocation2] sm:$0x3] %v255_v27 }
  0xda   :  { %v260_v28 = vld [vmem:[#allocation2] sm:$0xff] }
  0xdb   :  { %261 = vst [vmem:[#allocation3] sm:$0xff] %v260_v28 }
  0xdc   :  { %272 = dma.vmem_to_hbm [thread:$0]  %s268_s30, 128, %s270_s5, [#allocation4]  }
  0xdd   :  { %377 = dma.done.wait [#allocation4], 128  }
  0xde   :  { %378 = vsyncadd [#allocation4], 4294967168 }
  0xdf   :  { %277 = vsyncpa [#allocation4], 1 }

</bundles_post_ra>
